<compile_context>
chip_gen: v7x
topology: tpu7x:2x2x1
jax: 0.10.0
libtpu: 0.0.40
codegen_flags: <defaults>
</compile_context>

<pallas_src>
import functools

import jax
import jax.numpy as jnp
from jax.experimental import pallas as pl
from jax.experimental.pallas import tpu as pltpu


def _relation_gcn_kernel(clone_ref, food_ref, thorn_ref, crel_ref,
                         tmask_ref, cmask_ref,
                         w_clone_ref, w_thorn_ref, w_crel_ref, w_agg_ref,
                         bt_ref, bc_ref, ba_ref,
                         out_ref, *, compute_dtype):
    f32 = jnp.float32
    cdt = compute_dtype                      # dtype of the big 4-D intermediates
    mdt = w_clone_ref.dtype                  # MXU operand dtype
    bb, c, h = clone_ref.shape
    t = tmask_ref.shape[1]
    m = bb * c
    neg_inf = float("-inf")

    clone = clone_ref[...]                                   # (bb, c, h) f32
    clone2 = clone.reshape(m, h)

    # ---- one fused (H, 4H) MXU pass for every matmul whose LHS is clone -----
    #   columns: [ wa[:H] | wt[:H] | wc[:H] | wc[H:2H] ]  (p_ag at lane 0)
    pc = jnp.dot(clone2.astype(mdt), w_clone_ref[...],
                 preferred_element_type=f32)                 # (m, 4H) f32
    p_ag = pc[:, 0 * h:1 * h]                                # aggregation term
    p_ci = pc[:, 1 * h:2 * h] + bt_ref[...]                  # thorn clone_i (+bt)
    p_i = pc[:, 2 * h:3 * h] + bc_ref[...]                   # clone clone_i (+bc)
    p_j = pc[:, 3 * h:4 * h]                                 # clone clone_j

    # ---- thorn branch --------------------------------------------------------
    # max_t( mask_t * relu(th + p_ci + bt) )
    #   == relu( max_t( where(mask_t, th, -inf) ) + (p_ci + bt) )
    th = jnp.dot(thorn_ref[...].reshape(m * t, h), w_thorn_ref[...],
                 preferred_element_type=cdt).reshape(bb, c, t, h)
    tmask = (tmask_ref[...] != 0)[:, None, :, :]             # (bb, 1, t, 1)
    tmax = jnp.max(jnp.where(tmask, th, neg_inf), axis=2)    # (bb, c, h) cdt
    thorn_out = jnp.maximum(tmax.reshape(m, h).astype(f32) + p_ci, 0.0)

    # ---- clone branch --------------------------------------------------------
    # max_j( mask_j * relu(cr + p_i + p_j + bc) )
    #   == relu( max_j( where(mask_j, cr + p_j, -inf) ) + (p_i + bc) )
    cr = jnp.dot(crel_ref[...].reshape(m * c, h), w_crel_ref[...],
                 preferred_element_type=cdt).reshape(bb, c, c, h)
    cr = cr + p_j.astype(cdt).reshape(bb, 1, c, h)
    cmask = (cmask_ref[...] != 0)[:, None, :, :]             # (bb, 1, c, 1)
    cmax = jnp.max(jnp.where(cmask, cr, neg_inf), axis=2)    # (bb, c, h) cdt
    clone_out = jnp.maximum(cmax.reshape(m, h).astype(f32) + p_i, 0.0)

    # ---- aggregation: clone + relu([clone|food|thorn_out|clone_out] Wa + ba) -
    # clone term came from the fused matmul; the rest is three accumulating
    # K=H matmuls (no lane concat).
    wagg = w_agg_ref[...]                                    # (3H, H)
    ya = (p_ag + ba_ref[...]
          + jnp.dot(food_ref[...].reshape(m, h), wagg[0 * h:1 * h],
                    preferred_element_type=f32)
          + jnp.dot(thorn_out.astype(mdt), wagg[1 * h:2 * h],
                    preferred_element_type=f32)
          + jnp.dot(clone_out.astype(mdt), wagg[2 * h:3 * h],
                    preferred_element_type=f32))
    out_ref[...] = clone + jnp.maximum(ya, 0.0).reshape(bb, c, h)


def _pad8(r):
    return -(-r // 8) * 8


def _per_sample_vmem_bytes(c, t, h, mdt_bytes, cdt_bytes):
    """VMEM footprint per batch sample: double-buffered I/O blocks PLUS the
    live in-kernel intermediates, with lane padding to 128."""
    lanes_h = -(-h // 128) * 128
    lanes_4h = -(-(4 * h) // 128) * 128
    io = 2 * (                                   # x2: BlockSpec double buffering
        _pad8(c) * lanes_h * 4                   # clone (f32)
        + _pad8(c) * lanes_h * mdt_bytes         # food
        + _pad8(c * t) * lanes_h * mdt_bytes     # thorn relation
        + _pad8(c * c) * lanes_h * mdt_bytes     # clone relation
        + _pad8(t) * 128 * 4                     # thorn mask (b, t, 1)
        + _pad8(c) * 128 * 4                     # clone mask (b, c, 1)
        + _pad8(c) * lanes_h * 4                 # output (f32)
    )
    inter = (
        2 * _pad8(c * t) * lanes_h * cdt_bytes   # th + masked copy
        + 3 * _pad8(c * c) * lanes_h * cdt_bytes # cr, +p_j broadcast, masked copy
        + _pad8(c) * lanes_4h * 4                # fused clone matmul output
        + 8 * _pad8(c) * lanes_h * 4             # small per-(b,c) temps
    )
    return io + inter


def _largest_divisor_leq(n, cap):
    cap = max(1, min(n, cap))
    for d in range(cap, 0, -1):
        if n % d == 0:
            return d
    return 1


def relation_gcn(food_relation, thorn_relation, clone, clone_relation,
                 thorn_mask, clone_mask, params, *,
                 matmul_dtype=jnp.bfloat16,     # MXU operand / HBM activation dtype
                 compute_dtype=jnp.bfloat16,    # big-intermediate dtype (f32 for v5e)
                 block_budget_bytes=3 * 1024 * 1024):
    """Pallas forward of RelationGCN.

    params = (wt, bt, wc, bc, wa, ba), weights stored as (in_dim, H) so
    y = x @ W + b; each MLP(in, H, H, layer_num=1, ReLU) is Linear + ReLU.
    """
    f32 = jnp.float32
    mdt = jnp.dtype(matmul_dtype)
    cdt = jnp.dtype(compute_dtype)
    if mdt == jnp.dtype(jnp.float32):
        cdt = jnp.dtype(jnp.float32)           # no point in narrower intermediates

    b, c, h = clone.shape
    t = thorn_relation.shape[2]
    wt, bt, wc, bc, wa, ba = params

    # ---- fuse / reorder weights once, outside the kernel ---------------------
    w_clone = jnp.concatenate(
        [wa[:h], wt[:h], wc[:h], wc[h:2 * h]], axis=1).astype(mdt)   # (H, 4H)
    w_thorn = wt[h:2 * h].astype(mdt)                                # (H, H)
    w_crel = wc[2 * h:3 * h].astype(mdt)                             # (H, H)
    w_agg = wa[h:4 * h].astype(mdt)                                  # (3H, H)
    bt2 = bt.reshape(1, h).astype(f32)
    bc2 = bc.reshape(1, h).astype(f32)
    ba2 = ba.reshape(1, h).astype(f32)

    # ---- activations: leading-batch 3-D views, bf16 on the wire --------------
    clone3 = clone.astype(f32)                                       # residual in f32
    food3 = food_relation.reshape(b, c, h).astype(mdt)
    thorn3 = thorn_relation.reshape(b, c * t, h).astype(mdt)
    crel3 = clone_relation.reshape(b, c * c, h).astype(mdt)
    tmask3 = thorn_mask.reshape(b, t, 1).astype(f32)
    cmask3 = clone_mask.reshape(b, c, 1).astype(f32)

    # ---- batch block: VMEM budget (inputs + intermediates) and >=2 steps -----
    per_sample = _per_sample_vmem_bytes(c, t, h, mdt.itemsize, cdt.itemsize)
    cap_vmem = max(1, block_budget_bytes // per_sample)
    cap_steps = max(1, b // min(b, 4))          # prefer >=4 steps (>=2 for tiny b)
    bb = _largest_divisor_leq(b, min(cap_vmem, cap_steps))
    grid = (b // bb,)

    weight_bytes = int(2 * (w_clone.size + w_thorn.size + w_crel.size + w_agg.size)
                       * mdt.itemsize + 3 * h * 4)
    need = bb * per_sample + weight_bytes + (1 << 20)
    # keep well under v7x's 64 MiB physical VMEM / TC; still above v5e's 16 MiB
    # scoped default.
    vmem_limit = int(min(48 * 1024 * 1024, max(32 * 1024 * 1024, 2 * need)))

    def _batched(shape):
        nd = len(shape)
        return pl.BlockSpec(tuple(shape),
                            lambda i, _nd=nd: (i,) + (0,) * (_nd - 1))

    def _const(shape):
        nd = len(shape)
        return pl.BlockSpec(tuple(shape), lambda i, _nd=nd: (0,) * _nd)

    kernel = functools.partial(_relation_gcn_kernel, compute_dtype=cdt)

    out = pl.pallas_call(
        kernel,
        out_shape=jax.ShapeDtypeStruct((b, c, h), f32),
        grid_spec=pltpu.PrefetchScalarGridSpec(
            num_scalar_prefetch=0,
            grid=grid,
            in_specs=[
                _batched((bb, c, h)),            # clone (f32)
                _batched((bb, c, h)),            # food relation
                _batched((bb, c * t, h)),        # thorn relation
                _batched((bb, c * c, h)),        # clone relation
                _batched((bb, t, 1)),            # thorn mask
                _batched((bb, c, 1)),            # clone mask
                _const(w_clone.shape), _const(w_thorn.shape),
                _const(w_crel.shape), _const(w_agg.shape),
                _const(bt2.shape), _const(bc2.shape), _const(ba2.shape),
            ],
            out_specs=_batched((bb, c, h)),
        ),
        compiler_params=pltpu.CompilerParams(
            dimension_semantics=("parallel",),   # batch blocks are independent
            vmem_limit_bytes=vmem_limit,
        ),
    )(clone3, food3, thorn3, crel3, tmask3, cmask3,
      w_clone, w_thorn, w_crel, w_agg, bt2, bc2, ba2)

    return out


# --------------------------- test / reference --------------------------------

def _reference(food, thorn, cl, crel, tm, cm, params):
    wt, bt, wc, bc, wa, ba = params

    def mlp(x, w, bias):
        return jnp.maximum(x @ w + bias.reshape(-1), 0.0)

    b, c, h = cl.shape
    t = thorn.shape[2]
    tr = jnp.concatenate(
        [jnp.broadcast_to(cl[:, :, None, :], (b, c, t, h)), thorn], -1)
    tr = mlp(tr, wt, bt) * tm.reshape(b, 1, t, 1)
    tr = tr.max(2)
    cr = jnp.concatenate(
        [jnp.broadcast_to(cl[:, :, None, :], (b, c, c, h)),
         jnp.broadcast_to(cl[:, None, :, :], (b, c, c, h)),
         crel], -1)
    cr = mlp(cr, wc, bc) * cm.reshape(b, 1, c, 1)
    cr = cr.max(2)
    agg = jnp.concatenate([cl, food, tr, cr], -1)
    return cl + mlp(agg, wa, ba)


def _make_inputs(key, b, c, t, h):
    ks = jax.random.split(key, 12)
    clone = jax.random.normal(ks[0], (b, c, h), jnp.float32)
    food = jax.random.normal(ks[1], (b, c, h), jnp.float32)
    thorn = jax.random.normal(ks[2], (b, c, t, h), jnp.float32)
    crel = jax.random.normal(ks[3], (b, c, c, h), jnp.float32)
    tmask = (jax.random.uniform(ks[4], (b, t)) > 0.3).astype(jnp.float32)
    cmask = (jax.random.uniform(ks[5], (b, c)) > 0.3).astype(jnp.float32)
    # MLP(in_dim, H, H, layer_num=1, ReLU) == Linear(in_dim, H) + ReLU
    wt = jax.random.normal(ks[6], (2 * h, h), jnp.float32) * 0.1
    bt = jax.random.normal(ks[7], (1, h), jnp.float32) * 0.1
    wc = jax.random.normal(ks[8], (3 * h, h), jnp.float32) * 0.1
    bc = jax.random.normal(ks[9], (1, h), jnp.float32) * 0.1
    wa = jax.random.normal(ks[10], (4 * h, h), jnp.float32) * 0.1
    ba = jax.random.normal(ks[11], (1, h), jnp.float32) * 0.1
    return (food, thorn, clone, crel, tmask, cmask), (wt, bt, wc, bc, wa, ba)


if __name__ == "__main__":
    B, C, T, H = 2, 8, 8, 32

    inputs, params = _make_inputs(jax.random.PRNGKey(0), B, C, T, H)
    expected = _reference(*inputs, params)

    # 1) exact-semantics check: full f32 path must match the reference tightly.
    out_f32 = relation_gcn(*inputs, params,
                           matmul_dtype=jnp.float32, compute_dtype=jnp.float32)
    jax.block_until_ready(out_f32)
    assert out_f32.shape == (B, C, H)
    err = float(jnp.max(jnp.abs(out_f32 - expected)))
    assert jnp.allclose(out_f32, expected, atol=1e-4, rtol=1e-4), err

    # 2) default fast path (bf16 MXU operands / bf16 intermediates): loose
    #    tolerance against the f32 reference.
    out_bf16 = relation_gcn(*inputs, params)
    jax.block_until_ready(out_bf16)
    err_bf16 = float(jnp.max(jnp.abs(out_bf16 - expected)))
    assert jnp.allclose(out_bf16, expected, atol=1e-1, rtol=1e-1), err_bf16

    # 3) larger batch: multi-step grid (>=4 steps) exercising the batched
    #    index maps and the megacore-parallel axis.
    inputs2, params2 = _make_inputs(jax.random.PRNGKey(1), 8, C, T, H)
    out2 = relation_gcn(*inputs2, params2)
    jax.block_until_ready(out2)
    expected2 = _reference(*inputs2, params2)
    err2 = float(jnp.max(jnp.abs(out2 - expected2)))
    assert jnp.allclose(out2, expected2, atol=1e-1, rtol=1e-1), err2

    print("KERNEL_OK")
</pallas_src>

<mosaic_0001>
module attributes {stable_mosaic.version = 11 : i64} {
  func.func @_relation_gcn_kernel(%arg0: i32, %arg1: memref<1x8x32xf32, #tpu.memory_space<vmem>>, %arg2: memref<1x8x32xf32, #tpu.memory_space<vmem>>, %arg3: memref<1x64x32xf32, #tpu.memory_space<vmem>>, %arg4: memref<1x64x32xf32, #tpu.memory_space<vmem>>, %arg5: memref<1x8x1xf32, #tpu.memory_space<vmem>>, %arg6: memref<1x8x1xf32, #tpu.memory_space<vmem>>, %arg7: memref<32x128xf32, #tpu.memory_space<vmem>>, %arg8: memref<32x32xf32, #tpu.memory_space<vmem>>, %arg9: memref<32x32xf32, #tpu.memory_space<vmem>>, %arg10: memref<96x32xf32, #tpu.memory_space<vmem>>, %arg11: memref<1x32xf32, #tpu.memory_space<vmem>>, %arg12: memref<1x32xf32, #tpu.memory_space<vmem>>, %arg13: memref<1x32xf32, #tpu.memory_space<vmem>>, %arg14: memref<1x8x32xf32, #tpu.memory_space<vmem>>) attributes {dimension_semantics = [#tpu.dimension_semantics<parallel>], iteration_bounds = array<i64: 2>, scalar_prefetch = 0 : i64, scratch_operands = 0 : i64, tpu.core_type = #tpu.core_type<tc>, window_params = [{transform_indices = @transform_0, window_bounds = array<i64: 1, 8, 32>}, {transform_indices = @transform_1, window_bounds = array<i64: 1, 8, 32>}, {transform_indices = @transform_2, window_bounds = array<i64: 1, 64, 32>}, {transform_indices = @transform_3, window_bounds = array<i64: 1, 64, 32>}, {transform_indices = @transform_4, window_bounds = array<i64: 1, 8, 1>}, {transform_indices = @transform_5, window_bounds = array<i64: 1, 8, 1>}, {pipeline_mode = #tpu.pipeline_mode<synchronous>, transform_indices = @transform_6, window_bounds = array<i64: 32, 128>}, {pipeline_mode = #tpu.pipeline_mode<synchronous>, transform_indices = @transform_7, window_bounds = array<i64: 32, 32>}, {pipeline_mode = #tpu.pipeline_mode<synchronous>, transform_indices = @transform_8, window_bounds = array<i64: 32, 32>}, {pipeline_mode = #tpu.pipeline_mode<synchronous>, transform_indices = @transform_9, window_bounds = array<i64: 96, 32>}, {pipeline_mode = #tpu.pipeline_mode<synchronous>, transform_indices = @transform_10, window_bounds = array<i64: 1, 32>}, {pipeline_mode = #tpu.pipeline_mode<synchronous>, transform_indices = @transform_11, window_bounds = array<i64: 1, 32>}, {pipeline_mode = #tpu.pipeline_mode<synchronous>, transform_indices = @transform_12, window_bounds = array<i64: 1, 32>}, {transform_indices = @transform_13, window_bounds = array<i64: 1, 8, 32>}]} {
    %c0 = arith.constant 0 : index
    %c0_0 = arith.constant 0 : index
    %c0_1 = arith.constant 0 : index
    %0 = vector.load %arg1[%c0, %c0_0, %c0_1] : memref<1x8x32xf32, #tpu.memory_space<vmem>>, vector<1x8x32xf32>
    %1 = vector.shape_cast %0 : vector<1x8x32xf32> to vector<8x32xf32>
    %c0_2 = arith.constant 0 : index
    %c0_3 = arith.constant 0 : index
    %2 = vector.load %arg7[%c0_2, %c0_3] : memref<32x128xf32, #tpu.memory_space<vmem>>, vector<32x128xf32>
    %cst = arith.constant dense<0.000000e+00> : vector<8x128xf32>
    %3 = tpu.matmul %1, %2, %cst {dimension_numbers = #tpu.dot_dimension_numbers<[1], [0], [0], [1], [0, 0, 1, 1], [], []>} : vector<8x32xf32>, vector<32x128xf32>, vector<8x128xf32> -> vector<8x128xf32>
    %4 = vector.extract_strided_slice %3 {offsets = [0, 0], sizes = [8, 32], strides = [1, 1]} : vector<8x128xf32> to vector<8x32xf32>
    %5 = vector.extract_strided_slice %3 {offsets = [0, 32], sizes = [8, 32], strides = [1, 1]} : vector<8x128xf32> to vector<8x32xf32>
    %c0_4 = arith.constant 0 : index
    %c0_5 = arith.constant 0 : index
    %6 = vector.load %arg11[%c0_4, %c0_5] : memref<1x32xf32, #tpu.memory_space<vmem>>, vector<1x32xf32>
    %7 = vector.broadcast %6 : vector<1x32xf32> to vector<8x32xf32>
    %8 = arith.addf %5, %7 : vector<8x32xf32>
    %9 = vector.extract_strided_slice %3 {offsets = [0, 64], sizes = [8, 32], strides = [1, 1]} : vector<8x128xf32> to vector<8x32xf32>
    %c0_6 = arith.constant 0 : index
    %c0_7 = arith.constant 0 : index
    %10 = vector.load %arg12[%c0_6, %c0_7] : memref<1x32xf32, #tpu.memory_space<vmem>>, vector<1x32xf32>
    %11 = vector.broadcast %10 : vector<1x32xf32> to vector<8x32xf32>
    %12 = arith.addf %9, %11 : vector<8x32xf32>
    %13 = vector.extract_strided_slice %3 {offsets = [0, 96], sizes = [8, 32], strides = [1, 1]} : vector<8x128xf32> to vector<8x32xf32>
    %c0_8 = arith.constant 0 : index
    %c0_9 = arith.constant 0 : index
    %c0_10 = arith.constant 0 : index
    %14 = vector.load %arg3[%c0_8, %c0_9, %c0_10] : memref<1x64x32xf32, #tpu.memory_space<vmem>>, vector<1x64x32xf32>
    %15 = vector.shape_cast %14 : vector<1x64x32xf32> to vector<64x32xf32>
    %c0_11 = arith.constant 0 : index
    %c0_12 = arith.constant 0 : index
    %16 = vector.load %arg8[%c0_11, %c0_12] : memref<32x32xf32, #tpu.memory_space<vmem>>, vector<32x32xf32>
    %cst_13 = arith.constant dense<0.000000e+00> : vector<64x32xf32>
    %17 = tpu.matmul %15, %16, %cst_13 {dimension_numbers = #tpu.dot_dimension_numbers<[1], [0], [0], [1], [0, 0, 1, 1], [], []>} : vector<64x32xf32>, vector<32x32xf32>, vector<64x32xf32> -> vector<64x32xf32>
    %18 = vector.shape_cast %17 : vector<64x32xf32> to vector<1x8x8x32xf32>
    %c0_14 = arith.constant 0 : index
    %c0_15 = arith.constant 0 : index
    %c0_16 = arith.constant 0 : index
    %19 = vector.load %arg5[%c0_14, %c0_15, %c0_16] : memref<1x8x1xf32, #tpu.memory_space<vmem>>, vector<1x8x1xf32>
    %cst_17 = arith.constant 0.000000e+00 : f32
    %20 = vector.broadcast %cst_17 : f32 to vector<1x8x1xf32>
    %21 = arith.cmpf one, %19, %20 : vector<1x8x1xf32>
    %22 = vector.shape_cast %21 : vector<1x8x1xi1> to vector<1x1x8x1xi1>
    %cst_18 = arith.constant 0xFF800000 : f32
    %23 = vector.shape_cast %22 : vector<1x1x8x1xi1> to vector<1x1x8x1xi1>
    %24 = vector.broadcast %23 : vector<1x1x8x1xi1> to vector<1x8x8x32xi1>
    %25 = vector.broadcast %cst_18 : f32 to vector<1x8x8x32xf32>
    %26 = arith.select %24, %18, %25 : vector<1x8x8x32xi1>, vector<1x8x8x32xf32>
    %cst_19 = arith.constant dense<0xFF800000> : vector<1x8x32xf32>
    %27 = vector.multi_reduction <maximumf>, %26, %cst_19 [2] : vector<1x8x8x32xf32> to vector<1x8x32xf32>
    %28 = vector.shape_cast %27 : vector<1x8x32xf32> to vector<8x32xf32>
    %29 = arith.addf %28, %8 : vector<8x32xf32>
    %cst_20 = arith.constant 0.000000e+00 : f32
    %30 = vector.broadcast %cst_20 : f32 to vector<8x32xf32>
    %31 = arith.maximumf %29, %30 : vector<8x32xf32>
    %c0_21 = arith.constant 0 : index
    %c0_22 = arith.constant 0 : index
    %c0_23 = arith.constant 0 : index
    %32 = vector.load %arg4[%c0_21, %c0_22, %c0_23] : memref<1x64x32xf32, #tpu.memory_space<vmem>>, vector<1x64x32xf32>
    %33 = vector.shape_cast %32 : vector<1x64x32xf32> to vector<64x32xf32>
    %c0_24 = arith.constant 0 : index
    %c0_25 = arith.constant 0 : index
    %34 = vector.load %arg9[%c0_24, %c0_25] : memref<32x32xf32, #tpu.memory_space<vmem>>, vector<32x32xf32>
    %cst_26 = arith.constant dense<0.000000e+00> : vector<64x32xf32>
    %35 = tpu.matmul %33, %34, %cst_26 {dimension_numbers = #tpu.dot_dimension_numbers<[1], [0], [0], [1], [0, 0, 1, 1], [], []>} : vector<64x32xf32>, vector<32x32xf32>, vector<64x32xf32> -> vector<64x32xf32>
    %36 = vector.shape_cast %35 : vector<64x32xf32> to vector<1x8x8x32xf32>
    %37 = vector.shape_cast %13 : vector<8x32xf32> to vector<1x1x8x32xf32>
    %38 = vector.broadcast %37 : vector<1x1x8x32xf32> to vector<1x8x8x32xf32>
    %39 = arith.addf %36, %38 : vector<1x8x8x32xf32>
    %c0_27 = arith.constant 0 : index
    %c0_28 = arith.constant 0 : index
    %c0_29 = arith.constant 0 : index
    %40 = vector.load %arg6[%c0_27, %c0_28, %c0_29] : memref<1x8x1xf32, #tpu.memory_space<vmem>>, vector<1x8x1xf32>
    %cst_30 = arith.constant 0.000000e+00 : f32
    %41 = vector.broadcast %cst_30 : f32 to vector<1x8x1xf32>
    %42 = arith.cmpf one, %40, %41 : vector<1x8x1xf32>
    %43 = vector.shape_cast %42 : vector<1x8x1xi1> to vector<1x1x8x1xi1>
    %cst_31 = arith.constant 0xFF800000 : f32
    %44 = vector.shape_cast %43 : vector<1x1x8x1xi1> to vector<1x1x8x1xi1>
    %45 = vector.broadcast %44 : vector<1x1x8x1xi1> to vector<1x8x8x32xi1>
    %46 = vector.broadcast %cst_31 : f32 to vector<1x8x8x32xf32>
    %47 = arith.select %45, %39, %46 : vector<1x8x8x32xi1>, vector<1x8x8x32xf32>
    %cst_32 = arith.constant dense<0xFF800000> : vector<1x8x32xf32>
    %48 = vector.multi_reduction <maximumf>, %47, %cst_32 [2] : vector<1x8x8x32xf32> to vector<1x8x32xf32>
    %49 = vector.shape_cast %48 : vector<1x8x32xf32> to vector<8x32xf32>
    %50 = arith.addf %49, %12 : vector<8x32xf32>
    %cst_33 = arith.constant 0.000000e+00 : f32
    %51 = vector.broadcast %cst_33 : f32 to vector<8x32xf32>
    %52 = arith.maximumf %50, %51 : vector<8x32xf32>
    %c0_34 = arith.constant 0 : index
    %c0_35 = arith.constant 0 : index
    %53 = vector.load %arg10[%c0_34, %c0_35] : memref<96x32xf32, #tpu.memory_space<vmem>>, vector<96x32xf32>
    %c0_36 = arith.constant 0 : index
    %c0_37 = arith.constant 0 : index
    %54 = vector.load %arg13[%c0_36, %c0_37] : memref<1x32xf32, #tpu.memory_space<vmem>>, vector<1x32xf32>
    %55 = vector.broadcast %54 : vector<1x32xf32> to vector<8x32xf32>
    %56 = arith.addf %4, %55 : vector<8x32xf32>
    %c0_38 = arith.constant 0 : index
    %c0_39 = arith.constant 0 : index
    %c0_40 = arith.constant 0 : index
    %57 = vector.load %arg2[%c0_38, %c0_39, %c0_40] : memref<1x8x32xf32, #tpu.memory_space<vmem>>, vector<1x8x32xf32>
    %58 = vector.shape_cast %57 : vector<1x8x32xf32> to vector<8x32xf32>
    %59 = vector.extract_strided_slice %53 {offsets = [0, 0], sizes = [32, 32], strides = [1, 1]} : vector<96x32xf32> to vector<32x32xf32>
    %cst_41 = arith.constant dense<0.000000e+00> : vector<8x32xf32>
    %60 = tpu.matmul %58, %59, %cst_41 {dimension_numbers = #tpu.dot_dimension_numbers<[1], [0], [0], [1], [0, 0, 1, 1], [], []>} : vector<8x32xf32>, vector<32x32xf32>, vector<8x32xf32> -> vector<8x32xf32>
    %61 = arith.addf %56, %60 : vector<8x32xf32>
    %62 = vector.extract_strided_slice %53 {offsets = [32, 0], sizes = [32, 32], strides = [1, 1]} : vector<96x32xf32> to vector<32x32xf32>
    %cst_42 = arith.constant dense<0.000000e+00> : vector<8x32xf32>
    %63 = tpu.matmul %31, %62, %cst_42 {dimension_numbers = #tpu.dot_dimension_numbers<[1], [0], [0], [1], [0, 0, 1, 1], [], []>} : vector<8x32xf32>, vector<32x32xf32>, vector<8x32xf32> -> vector<8x32xf32>
    %64 = arith.addf %61, %63 : vector<8x32xf32>
    %65 = vector.extract_strided_slice %53 {offsets = [64, 0], sizes = [32, 32], strides = [1, 1]} : vector<96x32xf32> to vector<32x32xf32>
    %cst_43 = arith.constant dense<0.000000e+00> : vector<8x32xf32>
    %66 = tpu.matmul %52, %65, %cst_43 {dimension_numbers = #tpu.dot_dimension_numbers<[1], [0], [0], [1], [0, 0, 1, 1], [], []>} : vector<8x32xf32>, vector<32x32xf32>, vector<8x32xf32> -> vector<8x32xf32>
    %67 = arith.addf %64, %66 : vector<8x32xf32>
    %cst_44 = arith.constant 0.000000e+00 : f32
    %68 = vector.broadcast %cst_44 : f32 to vector<8x32xf32>
    %69 = arith.maximumf %67, %68 : vector<8x32xf32>
    %70 = vector.shape_cast %69 : vector<8x32xf32> to vector<1x8x32xf32>
    %71 = arith.addf %0, %70 : vector<1x8x32xf32>
    %c0_45 = arith.constant 0 : index
    %c0_46 = arith.constant 0 : index
    %c0_47 = arith.constant 0 : index
    %72 = vector.load %arg14[%c0_45, %c0_46, %c0_47] : memref<1x8x32xf32, #tpu.memory_space<vmem>>, vector<1x8x32xf32>
    tpu.vector_store %arg14[%c0_45, %c0_46, %c0_47], %71 {strides = array<i32>} : memref<1x8x32xf32, #tpu.memory_space<vmem>>, vector<1x8x32xf32>,
    return
  }
  func.func @transform_0(%arg0: i32) -> (i32, i32, i32) {
    %c0_i32 = arith.constant 0 : i32
    %c0_i32_0 = arith.constant 0 : i32
    %c0_i32_1 = arith.constant 0 : i32
    return %arg0, %c0_i32, %c0_i32_0 : i32, i32, i32
  }
  func.func @transform_1(%arg0: i32) -> (i32, i32, i32) {
    %c0_i32 = arith.constant 0 : i32
    %c0_i32_0 = arith.constant 0 : i32
    %c0_i32_1 = arith.constant 0 : i32
    return %arg0, %c0_i32, %c0_i32_0 : i32, i32, i32
  }
  func.func @transform_2(%arg0: i32) -> (i32, i32, i32) {
    %c0_i32 = arith.constant 0 : i32
    %c0_i32_0 = arith.constant 0 : i32
    %c0_i32_1 = arith.constant 0 : i32
    return %arg0, %c0_i32, %c0_i32_0 : i32, i32, i32
  }
  func.func @transform_3(%arg0: i32) -> (i32, i32, i32) {
    %c0_i32 = arith.constant 0 : i32
    %c0_i32_0 = arith.constant 0 : i32
    %c0_i32_1 = arith.constant 0 : i32
    return %arg0, %c0_i32, %c0_i32_0 : i32, i32, i32
  }
  func.func @transform_4(%arg0: i32) -> (i32, i32, i32) {
    %c0_i32 = arith.constant 0 : i32
    %c0_i32_0 = arith.constant 0 : i32
    %c0_i32_1 = arith.constant 0 : i32
    return %arg0, %c0_i32, %c0_i32_0 : i32, i32, i32
  }
  func.func @transform_5(%arg0: i32) -> (i32, i32, i32) {
    %c0_i32 = arith.constant 0 : i32
    %c0_i32_0 = arith.constant 0 : i32
    %c0_i32_1 = arith.constant 0 : i32
    return %arg0, %c0_i32, %c0_i32_0 : i32, i32, i32
  }
  func.func @transform_6(%arg0: i32) -> (i32, i32) {
    %c0_i32 = arith.constant 0 : i32
    %c0_i32_0 = arith.constant 0 : i32
    %c0_i32_1 = arith.constant 0 : i32
    return %c0_i32, %c0_i32_0 : i32, i32
  }
  func.func @transform_7(%arg0: i32) -> (i32, i32) {
    %c0_i32 = arith.constant 0 : i32
    %c0_i32_0 = arith.constant 0 : i32
    %c0_i32_1 = arith.constant 0 : i32
    return %c0_i32, %c0_i32_0 : i32, i32
  }
  func.func @transform_8(%arg0: i32) -> (i32, i32) {
    %c0_i32 = arith.constant 0 : i32
    %c0_i32_0 = arith.constant 0 : i32
    %c0_i32_1 = arith.constant 0 : i32
    return %c0_i32, %c0_i32_0 : i32, i32
  }
  func.func @transform_9(%arg0: i32) -> (i32, i32) {
    %c0_i32 = arith.constant 0 : i32
    %c0_i32_0 = arith.constant 0 : i32
    %c0_i32_1 = arith.constant 0 : i32
    return %c0_i32, %c0_i32_0 : i32, i32
  }
  func.func @transform_10(%arg0: i32) -> (i32, i32) {
    %c0_i32 = arith.constant 0 : i32
    %c0_i32_0 = arith.constant 0 : i32
    %c0_i32_1 = arith.constant 0 : i32
    return %c0_i32, %c0_i32_0 : i32, i32
  }
  func.func @transform_11(%arg0: i32) -> (i32, i32) {
    %c0_i32 = arith.constant 0 : i32
    %c0_i32_0 = arith.constant 0 : i32
    %c0_i32_1 = arith.constant 0 : i32
    return %c0_i32, %c0_i32_0 : i32, i32
  }
  func.func @transform_12(%arg0: i32) -> (i32, i32) {
    %c0_i32 = arith.constant 0 : i32
    %c0_i32_0 = arith.constant 0 : i32
    %c0_i32_1 = arith.constant 0 : i32
    return %c0_i32, %c0_i32_0 : i32, i32
  }
  func.func @transform_13(%arg0: i32) -> (i32, i32, i32) {
    %c0_i32 = arith.constant 0 : i32
    %c0_i32_0 = arith.constant 0 : i32
    %c0_i32_1 = arith.constant 0 : i32
    return %arg0, %c0_i32, %c0_i32_0 : i32, i32, i32
  }
}

</mosaic_0001>

<bundles_post_ra>
// kernel: tpu_custom_call.1
= control target key start
LH: loop header
LB: loop body
LE: loop exit
PB: predicated region body
PF: predicated region fallthrough
CT: control target
= control target key end

     0   :  { %s2379_s0 = inlined_call_operand.vmem [shape: f32[2,8,32], index: 0, kind: input, shape index: {}]   ;;  %s2380_s1 = inlined_call_operand.vmem [shape: f32[2,8,32], index: 1, kind: input, shape index: {}]   ;;  %s2381_s2 = inlined_call_operand.vmem [shape: f32[2,64,32], index: 2, kind: input, shape index: {}]   ;;  %s2382_s3 = inlined_call_operand.vmem [shape: f32[2,64,32], index: 3, kind: input, shape index: {}]   ;;  %s2383_s4 = inlined_call_operand.vmem [shape: f32[2,8,1], index: 4, kind: input, shape index: {}]   ;;  %s2384_s5 = inlined_call_operand.vmem [shape: f32[2,8,1], index: 5, kind: input, shape index: {}]   ;;  %s2385_s6 = inlined_call_operand.vmem [shape: f32[32,128], index: 6, kind: input, shape index: {}]   ;;  %s2386_s7 = inlined_call_operand.vmem [shape: f32[32,32], index: 7, kind: input, shape index: {}]   ;;  %s2387_s8 = inlined_call_operand.vmem [shape: f32[32,32], index: 8, kind: input, shape index: {}]   ;;  %s2388_s9 = inlined_call_operand.vmem [shape: f32[96,32], index: 9, kind: input, shape index: {}]   ;;  %s2389_s10 = inlined_call_operand.vmem [shape: f32[1,32], index: 10, kind: input, shape index: {}]   ;;  %s2390_s11 = inlined_call_operand.vmem [shape: f32[1,32], index: 11, kind: input, shape index: {}]   ;;  %s2391_s12 = inlined_call_operand.vmem [shape: f32[1,32], index: 12, kind: input, shape index: {}]   ;;  %s2392_s13 = inlined_call_operand.hbm [shape: f32[2,8,32], index: 13, kind: output, shape index: {}]  }
   0x1   :  { %2400 = sst [smem:[#allocation10_spill]] %s2385_s6 }
   0x2   :  { %18 = vsyncpa [#allocation3], 0 }
   0x3   :  { %20 = vsyncpa [#allocation3 + $0x1], 0  ;;  %s1990_s25 = smov 0   ;;  %s1992_s26 = smov 0  }
   0x4   :  { %s1994_s27 = smov 0   ;;  %s1996_s28 = smov 0  }
   0x5 LB: > { %2401 = sst [smem:[#allocation5_spill]] %s1898_s25  ;;  %s2011_s29 = sadd.s32 4294967295, %s1910_s28   ;;  %s1910_s28 = sphi %s1996_s28, %s2412_s28   ;;  %s1906_s27 = sphi %s1994_s27, %s2414_s27   ;;  %s1902_s26 = sphi %s1992_s26, %s2416_s26   ;;  %s1898_s25 = sphi %s1990_s25, %s2415_s25  }
   0x6   : > { %2402 = sst [smem:[#allocation6_spill]] %s1906_s27  ;;  %s1586_s30 = sadd.s32 4294967294, %s1910_s28  }
   0x7   : > { %s2015_s14 = sadd.s32 1, %s1910_s28   ;;  %s336_s15 = sadd.s32 1, %s1906_s27 }
   0x8   : > { %2403 = sst [smem:[#allocation7_spill]] %s2015_s14  ;;  %s333_s16 = ssub.s32 %s1910_s28, %s2015_s14 }
   0x9   : > { %p346_p0 = scmp.ne.s32.totalorder %s1906_s27, %s1902_s26  ;;  %p334_p1 = scmp.eq.s32.totalorder %s333_s16, 0 }
   0xa   : > { %p347_p2 = scmp.eq.s32.totalorder %s2011_s29, 1  ;;  %p352_p3 = scmp.ne.s32.totalorder %s1902_s26, %s1898_s25 }
   0xb   : > { %p353_p4 = scmp.eq.s32.totalorder %s1586_s30, 1  ;;  %p1589_p7 = scmp.ge.s32.totalorder %s1910_s28, 1 }
   0xc   : > { %s2026_s17 = scalar_select %p334_p1, %s1906_s27, %s336_s15  }
   0xd   : > { %p2028_p5 = por %p347_p2, %p346_p0  ;;  %p2032_p6 = por %p353_p4, %p352_p3 }
   0xe   : > { %2404 = sst [smem:[#allocation8_spill]] %s2026_s17  ;;  %p436_p8 = scmp.lt.s32.totalorder %s1910_s28, 3 }
   0xf   : > { %s2406_s19 = scalar_select %p2032_p6, 1, 0 }
  0x10   : > { %p437_p9 = pnand %p1589_p7, %p436_p8 }
  0x11   : > { %2407 = sst [smem:[#allocation9_spill]] %s2406_s19  ;;  %s2408_s6 = sld [smem:[#allocation10_spill]] (!%p437_p9)  ;;  %v1912_v3 = vmov (!%p437_p9), 0.0|0.0   ;;  %vm1913_vm0 = vmmov (!%p437_p9), 0   ;;  %v1914_v6 = vmov (!%p437_p9), 0.0   ;;  %v894_v7 = vld [vmem:[%s2387_s8] sm:$0xff] (!%p437_p9) }
  0x12   : > { %440 = sbr.rel (%p437_p9) target bundleno = 636 (0x27c), region = 72  ;;  %1756 = vmatprep.subr.bf16.mxu0 (!%p437_p9), %v1912_v3  ;;  %1680 = vmatprep.mubr.msk.f32.mxu0 (!%p437_p9), %vm1913_vm0, %v1914_v6  ;;  %p501_p10 = scmp.lt.s32.totalorder (!%p437_p9), %s2011_s29, 1  ;;  %v895_v8 = vld [vmem:[%s2387_s8 + $0x8] sm:$0xff] (!%p437_p9)  ;;  %v896_v10 = vld [vmem:[%s2387_s8 + $0x10] sm:$0xff] (!%p437_p9)  ;;  %v1915_v11 = vmov (!%p437_p9), 0   ;;  %v634_v13 = vld [vmem:[%s2386_s7] sm:$0xff] (!%p437_p9) }
  0x13   : > { %1846 = vset.pattern.permute.xlu1 (!%p437_p9), %v1915_v11  ;;  %v1770_v12 = vpack.c.bf16 (!%p437_p9), %v895_v8, %v894_v7  ;;  %v635_v14 = vld [vmem:[%s2386_s7 + $0x8] sm:$0xff] (!%p437_p9)  ;;  %v636_v15 = vld [vmem:[%s2386_s7 + $0x10] sm:$0xff] (!%p437_p9)  ;;  %1847 = vset.pattern.permute.xlu0 (!%p437_p9), %v1915_v11  ;;  %v897_v16 = vld [vmem:[%s2387_s8 + $0x18] sm:$0xff] (!%p437_p9)  ;;  %s1916_s27 = smov (!%p437_p9), 32   ;;  %vm532_vm1 = vcmask (!%p437_p9), 261120   ;;  %vm1262_vm6 = vcmask (!%p437_p9), 1041409  }
  0x14   : > { %v1762_v17 = vpack.c.bf16 (!%p437_p9), %v635_v14, %v634_v13  ;;  %v637_v18 = vld [vmem:[%s2386_s7 + $0x18] sm:$0xff] (!%p437_p9)  ;;  %v1600_v19 = vld [vmem:[%s2389_s10] ss:$0 sm:$0xff] (!%p437_p9)  ;;  %v1774_v24 = vpack.c.bf16 (!%p437_p9), %v897_v16, %v896_v10  ;;  %v1159_v27 = vld [vmem:[%s2388_s9 + $0x8] sm:$0xff] (!%p437_p9)  ;;  %vm1265_vm7 = vcmask (!%p437_p9), 1042434   ;;  %vm1268_vm8 = vcmask (!%p437_p9), 1043459  }
  0x15   : > { %v1766_v20 = vpack.c.bf16 (!%p437_p9), %v637_v18, %v636_v15  ;;  %612 = vrot.lane.b32.xlu0 (!%p437_p9), %v1600_v19, %s1916_s27  ;;  %v1601_v23 = vld [vmem:[%s2390_s11] ss:$0 sm:$0xff] (!%p437_p9)  ;;  %v1160_v36 = vld [vmem:[%s2388_s9 + $0x10] sm:$0xff] (!%p437_p9)  ;;  %v1161_v37 = vld [vmem:[%s2388_s9 + $0x18] sm:$0xff] (!%p437_p9)  ;;  %vm1271_vm9 = vcmask (!%p437_p9), 1044484   ;;  %vm1274_vm10 = vcmask (!%p437_p9), 1045509  }
  0x16   : > { %1763 = vmatprep.subr.bf16.mxu1 (!%p437_p9), %v1762_v17  ;;  %v1158_v26 = vld [vmem:[%s2388_s9] sm:$0xff] (!%p437_p9)  ;;  %v1782_v42 = vpack.c.bf16 (!%p437_p9), %v1161_v37, %v1160_v36  ;;  %v1163_v62 = vld [vmem:[%s2388_s9 + $0x28] sm:$0xff] (!%p437_p9)  ;;  %v1164_v8 = vld [vmem:[%s2388_s9 + $0x30] sm:$0xff] (!%p437_p9)  ;;  %vm1277_vm11 = vcmask (!%p437_p9), 1046534   ;;  %vm1280_vm12 = vcmask (!%p437_p9), 1047559   ;;  %s498_s19 = sand.u32 (!%p437_p9), 1, %s1902_s26  }
  0x17   : > { %v528_v0 = vld [vmem:[%s2408_s6] sm:$0xff] (!%p437_p9)  ;;  %v529_v1 = vld [vmem:[%s2408_s6 + $0x8] sm:$0xff] (!%p437_p9)  ;;  %v530_v2 = vld [vmem:[%s2408_s6 + $0x10] sm:$0xff] (!%p437_p9)  ;;  %1765 = vmatpush3.bf16.msra.mxu1 (!%p437_p9), %v1762_v17  ;;  %v1779_v33 = vpack.c.bf16 (!%p437_p9), %v1159_v27, %v1158_v26 }
  0x18   : > { %v1757_v4 = vpack.c.bf16 (!%p437_p9), %v529_v1, %v528_v0  ;;  %v531_v5 = vld [vmem:[%s2408_s6 + $0x18] sm:$0xff] (!%p437_p9)  ;;  %1767 = vmatprep.subr.bf16.mxu1 (!%p437_p9), %v1766_v20  ;;  %v1162_v61 = vld [vmem:[%s2388_s9 + $0x20] sm:$0xff] (!%p437_p9) }
  0x19   : > { %v1760_v9 = vpack.c.bf16 %v531_v5, %v530_v2  ;;  %s502_s24 = scalar_select %p501_p10, %s2011_s29, 1  ;;  %v1785_v0 = vpack.c.bf16 %v1163_v62, %v1162_v61 }
  0x1a   : > { %1758 = vmatpush3.bf16.msra.mxu0 %v1757_v4 }
  0x1b   : > { %1759 = vmatprep.subr.bf16.mxu0 %v1912_v3  ;;  %s2076_s30 = sshll.u32 %s502_s24, 3  ;;  %s1626_s15 = sshll.u32 %s502_s24, 6  ;;  %1769 = vmatpush3.bf16.msra.mxu1 %v1766_v20 }
  0x1c   : > { %s504_s14 = scalar_lea.vmem %s2379_s0, %s2076_s30  ;;  %s2094_s24 = scalar_lea.vmem %s2381_s2, %s1626_s15  ;;  %1784 = vmatprep.subr.bf16.mxu1 %v1912_v3 }
  0x1d   : > { %s2100_s20 = scalar_lea.vmem %s2382_s3, %s1626_s15  ;;  %v2102_v21 = vld [vmem:[%s504_s14] sm:$0xff]  ;;  %s2398_s14 = smov 64   ;;  %v627_v28 = vld [vmem:[%s2094_s24 + $0x8] sm:$0xff]  ;;  %v628_v29 = vld [vmem:[%s2094_s24 + $0x10] sm:$0xff] }
  0x1e   : > { %1761 = vmatpush3.bf16.msra.mxu0 %v1760_v9  ;;  %v626_v22 = vld [vmem:[%s2094_s24] sm:$0xff]  ;;  %622 = vrot.lane.b32.xlu0 %v1601_v23, %s2398_s14  ;;  %s522_s22 = scalar_lea.vmem %s2383_s4, %s2076_s30  ;;  %s526_s17 = scalar_lea.vmem %s2384_s5, %s2076_s30  ;;  %v887_v32 = vld [vmem:[%s2100_s20 + $0x8] sm:$0xff]  ;;  %v888_v35 = vld [vmem:[%s2100_s20 + $0x10] sm:$0xff] }
  0x1f   : > { %1771 = vmatprep.subr.bf16.mxu0 %v1770_v12  ;;  %v886_v25 = vld [vmem:[%s2100_s20] sm:$0xff]  ;;  %1691 = vmatprep.mubr.msk.f32.mxu1 %vm532_vm1, %v626_v22  ;;  %v629_v38 = vld [vmem:[%s2094_s24 + $0x18] sm:$0xff]  ;;  %v631_v44 = vld [vmem:[%s2094_s24 + $0x28] sm:$0xff]  ;;  %s1590_s14 = sshll.u32 %s498_s19, 3  ;;  %s1623_s15 = sshll.u32 %s2011_s29, 7 }
  0x20   : > { %v767_v30 = vld [vmem:[%s522_s22] sm:$0xff]  ;;  %1692 = vmatmul.mubr.msk.f32.vlgmr.msra.gmra.mrb[0].mxu1 %vm532_vm1, %v627_v28  ;;  %v889_v41 = vld [vmem:[%s2100_s20 + $0x18] sm:$0xff]  ;;  %v632_v45 = vld [vmem:[%s2094_s24 + $0x30] sm:$0xff]  ;;  %s500_s21 = scalar_lea.vmem [#allocation2], %s1590_s14  ;;  %s1919_s29 = smov [#allocation2]  }
  0x21   : > { %1681 = vmatmul.mubr.msk.f32.vlgmr.msra.gmra.mrb[0].mxu0 %vm532_vm1, %v2102_v21  ;;  %v1039_v31 = vld [vmem:[%s526_s17] sm:$0xff]  ;;  %vm768_vm2 = vcmp.ne.f32.partialorder %v767_v30, 0.0  ;;  %1694 = vmatprep.mubr.msk.f32.mxu1 %vm532_vm1, %v628_v29  ;;  %v891_v46 = vld [vmem:[%s2100_s20 + $0x28] sm:$0xff]  ;;  %v892_v47 = vld [vmem:[%s2100_s20 + $0x30] sm:$0xff]  ;;  %s508_s17 = scalar_lea.vmem %s2380_s1, %s2076_s30  ;;  %s1918_s30 = smov 96  }
  0x22   : > { %1773 = vmatpush3.bf16.msra.mxu0 %v1770_v12  ;;  %1711 = vmatprep.mubr.msk.f32.mxu0 %vm532_vm1, %v886_v25  ;;  %v769_v34 = vsel %vm768_vm2, 1, %v1915_v11  ;;  %vm1040_vm3 = vcmp.ne.f32.partialorder %v1039_v31, 0.0  ;;  %v630_v39 = vld [vmem:[%s2094_s24 + $0x20] sm:$0xff]  ;;  %v633_v48 = vld [vmem:[%s2094_s24 + $0x38] sm:$0xff]  ;;  %s2409_s24 = smov 64   ;;  %s1467_s22 = sshll.u32 %s500_s21, 4  ;;  %s2338_s22 = int_to_ptr.vmem [resolvable:$true] %s1467_s22 }
  0x23   : > { %1775 = vmatprep.subr.bf16.mxu0 %v1774_v24  ;;  %771 = vperm.xlu1 %1846, %v769_v34   ;;  %v1041_v40 = vsel %vm1040_vm3, 1, %v1915_v11  ;;  %v890_v43 = vld [vmem:[%s2100_s20 + $0x20] sm:$0xff]  ;;  %v893_v49 = vld [vmem:[%s2100_s20 + $0x38] sm:$0xff]  ;;  %s1852_s20 = sshll.u32 %s1919_s29, 4  ;;  %s1853_s20 = int_to_ptr.vmem [resolvable:$false] %s1852_s20 }
  0x24   : > { %1695 = vmatmul.mubr.msk.f32.gmra.mrb[2].mxu1 %vm532_vm1, %v629_v38  ;;  %v1178_v50 = vld [vmem:[%s508_s17] sm:$0xff]  ;;  %v1165_v9 = vld [vmem:[%s2388_s9 + $0x38] sm:$0xff]  ;;  %s2336_s17 = scalar_lea.hbm %s2392_s13, %s1623_s15  ;;  %s1854_s16 = scalar_lea.vmem %s1853_s20, 256 }
  0x25   : > { %1697 = vmatprep.mubr.msk.f32.mxu1 %vm532_vm1, %v630_v39  ;;  %1786 = vmatpush3.bf16.msra.mxu1 %v1785_v0  ;;  %v1788_v11 = vpack.c.bf16 %v1165_v9, %v1164_v8  ;;  %v1618_v25 = vld [vmem:[%s2391_s12] ss:$0 sm:$0xff]  ;;  %p1855_p0 = scmp.lt.s32.totalorder %s2338_s22, %s1853_s20 }
  0x26   : > { %1777 = vmatpush3.bf16.msra.mxu0 %v1774_v24  ;;  %1787 = vmatprep.subr.bf16.mxu1 %v1912_v3 }
  0x27   : > { %1778 = vmatprep.subr.bf16.mxu0 %v1912_v3  ;;  %1043 = vperm.xlu1 %1846, %v1041_v40  }
  0x28   : > { %1698 = vmatmul.mubr.msk.f32.gmra.mrb[4].mxu1 %vm532_vm1, %v631_v44 }
  0x29   : > { %1712 = vmatmul.mubr.msk.f32.vlgmr.msra.gmra.mrb[2].mxu0 %vm532_vm1, %v887_v32  ;;  %1700 = vmatprep.mubr.msk.f32.mxu1 %vm532_vm1, %v632_v45 }
  0x2a   : > { %1714 = vmatprep.mubr.msk.f32.mxu0 %vm532_vm1, %v888_v35  ;;  %1780 = vmatpush3.bf16.msra.mxu0 %v1779_v33 }
  0x2b   : > { %1781 = vmatprep.subr.bf16.mxu0 %v1912_v3  ;;  %1789 = vmatpush3.bf16.msra.mxu1 %v1788_v11 }
  0x2c   : > { %1701 = vmatmul.mubr.msk.f32.gmra.mrb[6].mxu1 %vm532_vm1, %v633_v48  ;;  %1790 = vmatprep.subr.bf16.mxu1 %v1912_v3 }
  0x2d   : > { %1715 = vmatmul.mubr.msk.f32.gmra.mrb[4].mxu0 %vm532_vm1, %v889_v41  ;;  %1742 = vmatprep.mubr.msk.f32.mxu1 %vm1913_vm0, %v1914_v6 }
  0x2e   : > { %1717 = vmatprep.mubr.msk.f32.mxu0 %vm532_vm1, %v890_v43  ;;  %1783 = vmatpush3.bf16.msra.mxu0 %v1782_v42 }
  0x31   : > { %1718 = vmatmul.mubr.msk.f32.gmra.mrb[6].mxu0 %vm532_vm1, %v891_v46 }
  0x32   : > { %1720 = vmatprep.mubr.msk.f32.mxu0 %vm532_vm1, %v892_v47 }
  0x35   : > { %1721 = vmatmul.mubr.msk.f32.gmra.mrb[8].mxu0 %vm532_vm1, %v893_v49 }
  0x36   : > { %1731 = vmatprep.mubr.msk.f32.mxu0 %vm1913_vm0, %v1914_v6 }
  0x39   : > { %1732 = vmatmul.mubr.msk.f32.vlgmr.msra.gmra.mrb[10].mxu0 %vm532_vm1, %v1178_v50 }
  0x87   : > { %v613_v51 = vpop.permute.xlu0 %612 }
  0x90   : > { %v623_v55 = vpop.permute.xlu0 %622 }
  0xa2   : > { %v772_v37 = vpop.permute.xlu1 %771 }
  0xa3   : > { %vm773_vm4 = vcmp.eq.s32.totalorder %v772_v37, 1 }
  0xf3   : > { %v1693_v58 = vpop.f32.mrb[0].mxu1 }
  0xf4   : > { %v602_v52 = vpop.f32.mrb[0].mxu0  ;;  %v728_v59 = vpop.f32.mrb[1].mxu1  ;;  %v775_v39 = vsel %vm773_vm4, %v1693_v58, -inf }
  0xf5   : > { %v615_v53 = vadd.f32 %v613_v51, %v602_v52  ;;  %1028 = vrot.lane.b32.xlu0 %v602_v52, %s1916_s27  ;;  %v1682_v54 = vpop.f32.mrb[1].mxu0  ;;  %v625_v57 = vadd.f32 %v623_v55, %v602_v52  ;;  %v1177_v28 = vadd.f32 %v1618_v25, %v602_v52  ;;  %v774_v38 = vsel %vm773_vm4, %v728_v59, -inf }
  0xf6   : > { %v782_v44 = vsel %vm532_vm1, %v774_v38, -inf  ;;  %v789_v45 = vsel %vm532_vm1, %v775_v39, -inf }
  0xf7   : > { %846 = vrot.lane.b32.xlu1 %v615_v53, %s1918_s30  ;;  %v840_v56 = vrot.slane %v615_v53, 2  ;;  %v841_v60 = vrot.slane %v615_v53, 3  ;;  %v839_v1 = vrot.slane %v615_v53, 1  ;;  %v1696_v4 = vpop.f32.mrb[2].mxu1  ;;  %v843_v5 = vrot.slane %v615_v53, 5 }
  0xf8   : > { %v738_v7 = vpop.f32.mrb[3].mxu1  ;;  %v842_v12 = vrot.slane %v615_v53, 4  ;;  %v845_v15 = vrot.slane %v615_v53, 7  ;;  %v844_v18 = vrot.slane %v615_v53, 6  ;;  %v1112_v22 = vrot.slane %v625_v57, 2 }
  0xf9   : > { %850 = vrot.lane.b32.xlu0 %v840_v56, %s1918_s30  ;;  %v1111_v26 = vrot.slane %v625_v57, 1  ;;  %v1113_v29 = vrot.slane %v625_v57, 3  ;;  %v1114_v32 = vrot.slane %v625_v57, 4  ;;  %v1115_v34 = vrot.slane %v625_v57, 5 }
  0xfa   : > { %v1116_v35 = vrot.slane %v625_v57, 6  ;;  %v1117_v36 = vrot.slane %v625_v57, 7  ;;  %v776_v40 = vsel %vm773_vm4, %v738_v7, -inf  ;;  %v777_v41 = vsel %vm773_vm4, %v1696_v4, -inf }
  0xfb   : > { %1118 = vrot.lane.b32.xlu1 %v625_v57, %s2409_s24  ;;  %v1699_v14 = vpop.f32.mrb[4].mxu1  ;;  %v796_v47 = vsel %vm532_vm1, %v776_v40, -inf  ;;  %v803_v48 = vsel %vm532_vm1, %v777_v41, -inf  ;;  %v783_v52 = vrot.slane %v782_v44, 4  ;;  %v790_v53 = vrot.slane %v789_v45, 4 }
  0xfc   : > { %v2186_v63 = vpop.f32.mrb[2].mxu0  ;;  %v748_v16 = vpop.f32.mrb[5].mxu1  ;;  %v779_v42 = vsel %vm773_vm4, %v1699_v14, -inf  ;;  %v797_v55 = vrot.slane %v796_v47, 4  ;;  %v804_v56 = vrot.slane %v803_v48, 4 }
  0xfd   : > { %852 = vrot.lane.b32.xlu0 %v841_v60, %s1918_s30  ;;  %v2189_v2 = vpop.f32.mrb[3].mxu0  ;;  %v778_v43 = vsel %vm773_vm4, %v748_v16, -inf  ;;  %v817_v49 = vsel %vm532_vm1, %v779_v42, -inf  ;;  %v784_v61 = vmax.f32 %v782_v44, %v783_v52  ;;  %v791_v62 = vmax.f32 %v789_v45, %v790_v53  ;;  %v2242_v44 = vld [vmem:[%s2388_s9 + $0x40] sm:$0xff]  ;;  %v2247_v45 = vld [vmem:[%s2388_s9 + $0x48] sm:$0xff] }
  0xfe   : > { %v810_v51 = vsel %vm532_vm1, %v778_v43, -inf  ;;  %v818_v57 = vrot.slane %v817_v49, 4  ;;  %v805_v4 = vmax.f32 %v803_v48, %v804_v56 }
  0xff   : > { %848 = vrot.lane.b32.xlu1 %v839_v1, %s1918_s30  ;;  %v1702_v20 = vpop.f32.mrb[6].mxu1  ;;  %v811_v59 = vrot.slane %v810_v51, 4  ;;  %v798_v1 = vmax.f32 %v796_v47, %v797_v55  ;;  %v785_v9 = vrot.slane %v784_v61, 2  ;;  %v792_v11 = vrot.slane %v791_v62, 2 }
 0x100   : > { %v2199_v10 = vpop.f32.mrb[4].mxu0  ;;  %v758_v23 = vpop.f32.mrb[7].mxu1  ;;  %v781_v46 = vsel %vm773_vm4, %v1702_v20, -inf }
 0x101   : > { %856 = vrot.lane.b32.xlu0 %v843_v5, %s1918_s30  ;;  %v2202_v13 = vpop.f32.mrb[5].mxu0  ;;  %v780_v50 = vsel %vm773_vm4, %v758_v23, -inf  ;;  %v831_v54 = vsel %vm532_vm1, %v781_v46, -inf  ;;  %v819_v5 = vmax.f32 %v817_v49, %v818_v57  ;;  %v812_v7 = vmax.f32 %v810_v51, %v811_v59 }
 0x102   : > { %v824_v58 = vsel %vm532_vm1, %v780_v50, -inf  ;;  %v832_v60 = vrot.slane %v831_v54, 4  ;;  %v799_v14 = vrot.slane %v798_v1, 2  ;;  %v793_v23 = vmax.f32 %v791_v62, %v792_v11 }
 0x103   : > { %854 = vrot.lane.b32.xlu1 %v842_v12, %s1918_s30  ;;  %v825_v0 = vrot.slane %v824_v58, 4  ;;  %v820_v16 = vrot.slane %v819_v5, 2  ;;  %v1791_v59 = vpack.c.bf16 %v2247_v45, %v2242_v44 }
 0x104   : > { %v2206_v17 = vpop.f32.mrb[6].mxu0  ;;  %v833_v8 = vmax.f32 %v831_v54, %v832_v60 }
 0x105   : > { %860 = vrot.lane.b32.xlu0 %v845_v15, %s1918_s30  ;;  %v2209_v19 = vpop.f32.mrb[7].mxu0  ;;  %v826_v12 = vmax.f32 %v824_v58, %v825_v0  ;;  %v806_v15 = vrot.slane %v805_v4, 2 }
 0x106   : > { %v834_v20 = vrot.slane %v833_v8, 2 }
 0x107   : > { %858 = vrot.lane.b32.xlu1 %v844_v18, %s1918_s30  ;;  %v813_v18 = vrot.slane %v812_v7, 2  ;;  %v827_v25 = vrot.slane %v826_v12, 2  ;;  %s1454_s30 = scalar_lea.sflag [#allocation3], %s498_s19 }
 0x108   : > { %v2212_v24 = vpop.f32.mrb[8].mxu0 }
 0x109   : > { %1122 = vrot.lane.b32.xlu0 %v1112_v22, %s2409_s24  ;;  %v2218_v27 = vpop.f32.mrb[9].mxu0  ;;  %v786_v22 = vmax.f32 %v784_v61, %v785_v9  ;;  %v828_v39 = vmax.f32 %v826_v12, %v827_v25 }
 0x10b   : > { %1120 = vrot.lane.b32.xlu1 %v1111_v26, %s2409_s24  ;;  %v800_v26 = vmax.f32 %v798_v1, %v799_v14  ;;  %v829_v50 = vrot.slane %v828_v39, 1 }
 0x10c   : > { %v1248_v30 = vpop.f32.mrb[10].mxu0 }
 0x10d   : > { %v2221_v31 = vadd.f32 %v1248_v30, %v1177_v28  ;;  %1124 = vrot.lane.b32.xlu0 %v1113_v29, %s2409_s24  ;;  %v1733_v33 = vpop.f32.mrb[11].mxu0  ;;  %v807_v28 = vmax.f32 %v805_v4, %v806_v15  ;;  %v821_v29 = vmax.f32 %v819_v5, %v820_v16  ;;  %v814_v30 = vmax.f32 %v812_v7, %v813_v18 }
 0x10e   : > { %v794_v33 = vrot.slane %v793_v23, 1  ;;  %v2274_v4 = vmax.f32 %v828_v39, %v829_v50 }
 0x10f   : > { %1126 = vrot.lane.b32.xlu1 %v1114_v32, %s2409_s24  ;;  %v787_v32 = vrot.slane %v786_v22, 1  ;;  %v808_v37 = vrot.slane %v807_v28, 1  ;;  %v822_v38 = vrot.slane %v821_v29, 1  ;;  %v815_v40 = vrot.slane %v814_v30, 1 }
 0x110   : > { %v795_v42 = vmax.f32 %v793_v23, %v794_v33 }
 0x111   : > { %1128 = vrot.lane.b32.xlu0 %v1115_v34, %s2409_s24  ;;  %v835_v34 = vmax.f32 %v833_v8, %v834_v20  ;;  %v788_v41 = vmax.f32 %v786_v22, %v787_v32  ;;  %v809_v48 = vmax.f32 %v807_v28, %v808_v37  ;;  %v2249_v49 = vmax.f32 %v821_v29, %v822_v38 }
 0x112   : > { %v2255_v56 = vmax.f32 %v814_v30, %v815_v40 }
 0x113   : > { %1130 = vrot.lane.b32.xlu1 %v1116_v35, %s2409_s24  ;;  %v2236_v35 = vpop.permute.xlu1 %1043  ;;  %v836_v43 = vrot.slane %v835_v34, 1 }
 0x114   : > { %vm1045_vm5 = vcmp.eq.s32.totalorder %v2236_v35, 1  ;;  %v1168_v35 = vld [vmem:[%s2388_s9 + $0x50] sm:$0xff] }
 0x115   : > { %1132 = vrot.lane.b32.xlu0 %v1117_v36, %s2409_s24  ;;  %v801_v36 = vrot.slane %v800_v26, 1  ;;  %s1848_s24 = scalar_lea.vmem %s2338_s22, 128 }
 0x116   : > { %p1849_p11 = scmp.ne.s32.totalorder %s2338_s22, %s1848_s24  ;;  %p1856_p1 = scmp.lt.s32.totalorder %s1854_s16, %s1848_s24 }
 0x117   : > { %v802_v47 = vmax.f32 %v800_v26, %v801_v36 }
 0x118   : > { %p1850_p12 = pnand %p1849_p11, %p2028_p5  ;;  %p1857_p2 = por %p1856_p1, %p1855_p0 }
 0x11a   : > { %p1851_p13 = pneg %p1850_p12 }
 0x11c   : > { %p1858_p3 = pnand %p1857_p2, %p1851_p13 }
 0x167   : > { %v1029_v46 = vpop.permute.xlu0 %1028 }
 0x168   : > { %v1031_v51 = vadd.f32 %v1029_v46, %v2189_v2  ;;  %v1033_v52 = vadd.f32 %v1029_v46, %v2202_v13  ;;  %v1032_v53 = vadd.f32 %v2186_v63, %v1029_v46  ;;  %v1034_v54 = vadd.f32 %v2199_v10, %v1029_v46 }
 0x169   : > { %v847_v55 = vpop.permute.xlu1 %846  ;;  %v1035_v57 = vadd.f32 %v1029_v46, %v2209_v19  ;;  %v1036_v58 = vadd.f32 %v2206_v17, %v1029_v46  ;;  %v2263_v2 = vmax.f32 %v835_v34, %v836_v43  ;;  %v1037_v18 = vadd.f32 %v1029_v46, %v2218_v27 }
 0x16a   : > { %v1046_v60 = vsel %vm1045_vm5, %v1031_v51, -inf  ;;  %v1048_v63 = vsel %vm1045_vm5, %v1033_v52, -inf  ;;  %v1047_v10 = vsel %vm1045_vm5, %v1032_v53, -inf  ;;  %v1049_v62 = vsel %vm1045_vm5, %v1034_v54, -inf }
 0x16b   : > { %v851_v13 = vpop.permute.xlu0 %850  ;;  %v1054_v61 = vsel %vm532_vm1, %v1046_v60, -inf  ;;  %v1068_v19 = vsel %vm532_vm1, %v1048_v63, -inf  ;;  %v1061_v17 = vsel %vm532_vm1, %v1047_v10, -inf  ;;  %v1075_v9 = vsel %vm532_vm1, %v1049_v62, -inf }
 0x16c   : > { %v872_v0 = vadd.f32 %v851_v13, %v802_v47  ;;  %v1055_v1 = vrot.slane %v1054_v61, 4  ;;  %v1069_v5 = vrot.slane %v1068_v19, 4  ;;  %v1062_v8 = vrot.slane %v1061_v17, 4 }
 0x16d   : > { %v2276_v7 = vpop.permute.xlu1 %1118  ;;  %v1050_v11 = vsel %vm1045_vm5, %v1035_v57, -inf  ;;  %v1051_v12 = vsel %vm1045_vm5, %v1036_v58, -inf  ;;  %v1076_v16 = vrot.slane %v1075_v9, 4  ;;  %v2287_v26 = vadd.f32 %v2212_v24, %v1029_v46 }
 0x16e   : > { %v1056_v14 = vmax.f32 %v1054_v61, %v1055_v1  ;;  %v1070_v15 = vmax.f32 %v1068_v19, %v1069_v5  ;;  %v1063_v22 = vmax.f32 %v1061_v17, %v1062_v8  ;;  %v1082_v23 = vsel %vm532_vm1, %v1050_v11, -inf }
 0x16f   : > { %v853_v20 = vpop.permute.xlu0 %852  ;;  %v1089_v25 = vsel %vm532_vm1, %v1051_v12, -inf  ;;  %v870_v28 = vadd.f32 %v847_v55, %v788_v41  ;;  %v880_v33 = vmax.f32 %v872_v0, 0.0  ;;  %v1077_v37 = vmax.f32 %v1075_v9, %v1076_v16 }
 0x170   : > { %v1057_v29 = vrot.slane %v1056_v14, 2  ;;  %v873_v30 = vadd.f32 %v853_v20, %v809_v48  ;;  %v1071_v32 = vrot.slane %v1070_v15, 2  ;;  %v1064_v36 = vrot.slane %v1063_v22, 2 }
 0x171   : > { %v849_v34 = vpop.permute.xlu1 %848  ;;  %v1083_v27 = vrot.slane %v1082_v23, 4  ;;  %v1090_v43 = vrot.slane %v1089_v25, 4  ;;  %v1078_v24 = vrot.slane %v1077_v37, 2  ;;  %v878_v41 = vmax.f32 %v870_v28, 0.0 }
 0x172   : > { %v1058_v38 = vmax.f32 %v1056_v14, %v1057_v29  ;;  %v871_v39 = vadd.f32 %v849_v34, %v795_v42  ;;  %v1072_v40 = vmax.f32 %v1070_v15, %v1071_v32  ;;  %v881_v47 = vmax.f32 %v873_v30, 0.0 }
 0x173   : > { %v857_v50 = vpop.permute.xlu0 %856  ;;  %v1065_v51 = vmax.f32 %v1063_v22, %v1064_v36  ;;  %v1084_v46 = vmax.f32 %v1082_v23, %v1083_v27  ;;  %v1079_v58 = vmax.f32 %v1077_v37, %v1078_v24  ;;  %v1052_v13 = vsel %vm1045_vm5, %v1037_v18, -inf }
 0x174   : > { %v1059_v52 = vrot.slane %v1058_v38, 1  ;;  %v879_v48 = vmax.f32 %v871_v39, 0.0  ;;  %v875_v53 = vadd.f32 %v857_v50, %v2249_v49  ;;  %v1073_v55 = vrot.slane %v1072_v40, 1 }
 0x175   : > { %v855_v54 = vpop.permute.xlu1 %854  ;;  %v1066_v57 = vrot.slane %v1065_v51, 1  ;;  %v1085_v60 = vrot.slane %v1084_v46, 2  ;;  %v1264_v61 = vrot.slane %v880_v33, 6  ;;  %v1267_v19 = vrot.slane %v881_v47, 5 }
 0x176   : > { %v1261_v42 = vrot.slane %v879_v48, 7  ;;  %v883_v63 = vmax.f32 %v875_v53, 0.0  ;;  %v874_v10 = vadd.f32 %v855_v54, %v2255_v56  ;;  %v1091_v0 = vmax.f32 %v1089_v25, %v1090_v43 }
 0x177   : > { %v861_v17 = vpop.permute.xlu0 %860  ;;  %v1086_v62 = vmax.f32 %v1084_v46, %v1085_v60  ;;  %v1060_v49 = vmax.f32 %v1058_v38, %v1059_v52  ;;  %v1074_v8 = vmax.f32 %v1072_v40, %v1073_v55  ;;  %v1067_v56 = vmax.f32 %v1065_v51, %v1066_v57 }
 0x178   : > { %v1263_v1 = vsel %vm1262_vm6, %v1261_v42, %v878_v41  ;;  %v882_v5 = vmax.f32 %v874_v10, 0.0  ;;  %v877_v11 = vadd.f32 %v861_v17, %v2263_v2  ;;  %v1080_v14 = vrot.slane %v1079_v58, 1 }
 0x179   : > { %v1266_v9 = vsel %vm1265_vm7, %v1264_v61, %v1263_v1  ;;  %v859_v12 = vpop.permute.xlu1 %858  ;;  %v1273_v15 = vrot.slane %v883_v63, 3  ;;  %v1087_v25 = vrot.slane %v1086_v62, 1  ;;  %v1092_v28 = vrot.slane %v1091_v0, 2 }
 0x17a   : > { %v1269_v16 = vsel %vm1268_vm8, %v1267_v19, %v1266_v9  ;;  %v1270_v18 = vrot.slane %v882_v5, 4  ;;  %v876_v20 = vadd.f32 %v859_v12, %v2274_v4  ;;  %v885_v22 = vmax.f32 %v877_v11, 0.0 }
 0x17b   : > { %v1123_v23 = vpop.permute.xlu0 %1122  ;;  %v1096_v29 = vsel %vm532_vm1, %v1052_v13, -inf  ;;  %v1142_v34 = vadd.f32 %v2276_v7, %v1060_v49  ;;  %v1093_v27 = vmax.f32 %v1091_v0, %v1092_v28  ;;  %v1053_v4 = vsel %vm1045_vm5, %v2287_v26, -inf  ;;  %v1169_v26 = vld [vmem:[%s2388_s9 + $0x58] sm:$0xff] }
 0x17c   : > { %v1272_v30 = vsel %vm1271_vm9, %v1270_v18, %v1269_v16  ;;  %v884_v32 = vmax.f32 %v876_v20, 0.0  ;;  %v1144_v33 = vadd.f32 %v1123_v23, %v1074_v8  ;;  %v1097_v2 = vrot.slane %v1096_v29, 4 }
 0x17d   : > { %v1275_v36 = vsel %vm1274_vm10, %v1273_v15, %v1272_v30  ;;  %v1121_v37 = vpop.permute.xlu1 %1120  ;;  %v1081_v40 = vmax.f32 %v1079_v58, %v1080_v14  ;;  %v1279_v47 = vrot.slane %v885_v22, 1  ;;  %v1094_v24 = vrot.slane %v1093_v27, 1 }
 0x17e   : > { %v1276_v38 = vrot.slane %v884_v32, 2  ;;  %v1143_v39 = vadd.f32 %v1121_v37, %v1067_v56  ;;  %v1098_v43 = vmax.f32 %v1096_v29, %v1097_v2  ;;  %v1152_v50 = vmax.f32 %v1144_v33, 0.0 }
 0x17f   : > { %v1125_v51 = vpop.permute.xlu0 %1124  ;;  %v1103_v46 = vsel %vm532_vm1, %v1053_v4, -inf  ;;  %v1088_v48 = vmax.f32 %v1086_v62, %v1087_v25  ;;  %v1150_v53 = vmax.f32 %v1142_v34, 0.0  ;;  %v1095_v10 = vmax.f32 %v1093_v27, %v1094_v24 }
 0x180   : > { %v1278_v7 = vsel %vm1277_vm11, %v1276_v38, %v1275_v36  ;;  %v1151_v41 = vmax.f32 %v1143_v39, 0.0  ;;  %v1145_v52 = vadd.f32 %v1125_v51, %v1081_v40  ;;  %v1099_v57 = vrot.slane %v1098_v43, 2 }
 0x181   : > { %v1281_v54 = vsel %vm1280_vm12, %v1279_v47, %v1278_v7  ;;  %v1127_v55 = vpop.permute.xlu1 %1126  ;;  %v1104_v58 = vrot.slane %v1103_v46, 4  ;;  %v1365_v13 = vrot.slane %v1152_v50, 6  ;;  %v1794_v62 = vpack.c.bf16 %v1169_v26, %v1168_v35 }
 0x182   : > { %v1363_v60 = vrot.slane %v1151_v41, 7  ;;  %v1153_v42 = vmax.f32 %v1145_v52, 0.0  ;;  %v1146_v63 = vadd.f32 %v1127_v55, %v1088_v48  ;;  %1743 = vmatmul.mubr.msk.f32.vlgmr.msra.gmra.mrb[8].mxu1 %vm532_vm1, %v1281_v54  ;;  %v1100_v19 = vmax.f32 %v1098_v43, %v1099_v57 }
 0x183   : > { %v1129_v61 = vpop.permute.xlu0 %1128  ;;  %v1105_v17 = vmax.f32 %v1103_v46, %v1104_v58  ;;  %1792 = vmatpush3.bf16.msra.mxu1 %v1791_v59  ;;  %1753 = vmatprep.mubr.msk.f32.mxu1 %vm1913_vm0, %v1914_v6 }
 0x184   : > { %v1364_v0 = vsel %vm1262_vm6, %v1363_v60, %v1150_v53  ;;  %v1367_v49 = vrot.slane %v1153_v42, 5  ;;  %v1154_v1 = vmax.f32 %v1146_v63, 0.0  ;;  %v1147_v5 = vadd.f32 %v1129_v61, %v1095_v10  ;;  %1793 = vmatprep.subr.bf16.mxu1 %v1912_v3 }
 0x185   : > { %v1366_v8 = vsel %vm1265_vm7, %v1365_v13, %v1364_v0  ;;  %v1101_v9 = vrot.slane %v1100_v19, 1  ;;  %v1106_v11 = vrot.slane %v1105_v17, 2  ;;  %v1131_v45 = vpop.permute.xlu1 %1130 }
 0x186   : > { %v1368_v12 = vsel %vm1268_vm8, %v1367_v49, %v1366_v8  ;;  %v1369_v56 = vrot.slane %v1154_v1, 4  ;;  %v1155_v44 = vmax.f32 %v1147_v5, 0.0 }
 0x187   : > { %v1102_v59 = vmax.f32 %v1100_v19, %v1101_v9  ;;  %v1107_v14 = vmax.f32 %v1105_v17, %v1106_v11  ;;  %1795 = vmatpush3.bf16.msra.mxu1 %v1794_v62  ;;  %v1133_v20 = vpop.permute.xlu0 %1132 }
 0x188   : > { %v1370_v6 = vsel %vm1271_vm9, %v1369_v56, %v1368_v12  ;;  %v1371_v15 = vrot.slane %v1155_v44, 3 }
 0x189   : > { %v1148_v16 = vadd.f32 %v1131_v45, %v1102_v59  ;;  %v1108_v18 = vrot.slane %v1107_v14, 1 }
 0x18a   : > { %v1372_v3 = vsel %vm1274_vm10, %v1371_v15, %v1370_v6 }
 0x18b   : > { %v1156_v22 = vmax.f32 %v1148_v16, 0.0  ;;  %v1109_v23 = vmax.f32 %v1107_v14, %v1108_v18 }
 0x18d   : > { %v1373_v25 = vrot.slane %v1156_v22, 2  ;;  %v1149_v28 = vadd.f32 %v1133_v20, %v1109_v23 }
 0x18f   : > { %v1374_v29 = vsel %vm1277_vm11, %v1373_v25, %v1372_v3  ;;  %v1157_v30 = vmax.f32 %v1149_v28, 0.0 }
 0x191   : > { %v1375_v32 = vrot.slane %v1157_v30, 1 }
 0x193   : > { %v1376_v33 = vsel %vm1280_vm12, %v1375_v32, %v1374_v29 }
 0x194   : > { %1754 = vmatmul.mubr.msk.f32.vlgmr.msra.gmra.mrb[8].mxu1 %vm532_vm1, %v1376_v33 }
 0x267   : > { %v1445_v2 = vpop.f32.mrb[8].mxu1 }
 0x268   : > { %v1797_v34 = vadd.f32 %v1445_v2, %v2221_v31  ;;  %v1755_v36 = vpop.f32.mrb[9].mxu1 }
 0x26a   : > { %v1450_v37 = vmax.f32 %v1797_v34, 0.0 }
 0x26c   : > { %v1451_v27 = vadd.f32 %v1450_v37, %v2102_v21 }
 0x26e   : > { %1452 = vst.msk [vmem:[%s500_s21] sm:$0xff] %vm532_vm1, %v1451_v27 }
 0x26f   : > { %1861 = shalt.err (!%p1858_p3)
}
 0x270   : > { %s1862_s25 = scalar_lea.hbm %s2336_s17, 128  ;;  %s1866_s14 = scalar_lea.hbm %s2392_s13, 256 }
 0x271   : > { %p1863_p4 = scmp.ne.s32.totalorder %s2336_s17, %s1862_s25  ;;  %p1867_p9 = scmp.lt.u32.totalorder %s2336_s17, %s2392_s13 }
 0x272   : > { %p1868_p10 = scmp.lt.u32.totalorder %s1866_s14, %s1862_s25  ;;  %p1870_p12 = scmp.lt.u32.totalorder %s1862_s25, %s2336_s17 }
 0x273   : > { %p1864_p7 = pnand %p1863_p4, %p2028_p5 }
 0x274   : > { %p1869_p11 = por %p1868_p10, %p1867_p9 }
 0x275   : > { %p1865_p8 = pneg %p1864_p7 }
 0x276   : > { %p1871_p13 = por %p1870_p12, %p1869_p11 }
 0x278   : > { %p1872_p0 = pnand %p1871_p13, %p1865_p8 }
 0x27a   : > { %1875 = shalt.err (!%p1872_p0)
}
 0x27b   : > { %1800 = dma.vmem_to_hbm [thread:$0]  (%p2028_p5), %s2338_s22, 128, %s2336_s17, %s1454_s30  }
 0x27c PF: > { %s2410_s6 = sld [smem:[#allocation5_spill]]  ;;  %p1806_p1 = scmp.ge.s32.totalorder %s1910_s28, 2 }
 0x27e   : > { %p1803_p2 = pnand %p1806_p1, %p2032_p6 }
 0x282   : > { %s1479_s24 = sand.u32 1, %s2410_s6  }
 0x283   : > { %s1480_s29 = scalar_lea.sflag [#allocation3], %s1479_s24 }
 0x284   : > { %1893 = dma.done.wait (!%p1803_p2), %s1480_s29, 128  }
 0x285   : > { %1895 = vsyncadd (!%p1803_p2), %s1480_s29, 4294967168  ;;  %s2412_s28 = sld [smem:[#allocation7_spill]]  ;;  %s2413_s20 = sld [smem:[#allocation6_spill]] }
 0x286   : > { %s2414_s27 = sld [smem:[#allocation8_spill]]  ;;  %s2415_s25 = smov %s1902_s26 }
 0x28b   : > { %p23_p3 = scmp.ge.s32.totalorder %s2412_s28, 4   ;;  %s2416_s26 = smov %s2413_s20 }
 0x28d   :  { %25 = sbr.rel (!%p23_p3) target bundleno = 5 (0x5), region = 122 }
 0x294   :  { %1485 = vsyncpa [#allocation3], 1 }
 0x295   :  { %1487 = vsyncpa [#allocation3 + $0x1], 1 }

</bundles_post_ra>
